<compile_context>
chip_gen: v7x
topology: tpu7x:2x2x1
jax: 0.10.0
libtpu: 0.0.40
codegen_flags: <defaults>
</compile_context>

<pallas_src>
import jax
import jax.numpy as jnp
from jax.experimental import pallas as pl
from jax.experimental.pallas import tpu as pltpu


def qlinearnet_kernel(x_ref, w1_ref, b1_ref, w2_ref, b2_ref,
                      w3_ref, b3_ref, w4_ref, b4_ref, out_ref):
    # Hoisted bias loads (one f32 read each; biases stay f32 for VPU adds).
    b1 = b1_ref[...]
    b2 = b2_ref[...]
    b3 = b3_ref[...]
    b4 = b4_ref[...]

    # Layer 1: bf16 MXU matmul, f32 accumulate, f32 ReLU.
    h = jnp.dot(x_ref[...], w1_ref[...], preferred_element_type=jnp.float32) + b1
    h = jnp.maximum(h, 0.0)
    # Layer 2
    h = jnp.dot(h.astype(jnp.bfloat16), w2_ref[...],
                preferred_element_type=jnp.float32) + b2
    h = jnp.maximum(h, 0.0)
    # Layer 3
    h = jnp.dot(h.astype(jnp.bfloat16), w3_ref[...],
                preferred_element_type=jnp.float32) + b3
    h = jnp.maximum(h, 0.0)
    # Layer 4 + Sigmoid (f32 on EUP); lane-dense (padded-to-128) store.
    logits = jnp.dot(h.astype(jnp.bfloat16), w4_ref[...],
                     preferred_element_type=jnp.float32) + b4
    out_ref[...] = jax.nn.sigmoid(logits).astype(out_ref.dtype)


def qlinearnet_forward(x, params, *, tile_batch=512):
    """x: [B, input_size] float32; params: transposed weights (in, out) + biases (1, out)."""
    B, in_dim = x.shape
    h1 = params["w1"].shape[1]
    h2 = params["w2"].shape[1]
    h3 = params["w3"].shape[1]
    out_dim = params["w4"].shape[1]

    # --- lane-dense output: pad final out-features up to a multiple of 128 lanes ---
    out_pad = max(128, ((out_dim + 127) // 128) * 128)
    w4_p = jnp.zeros((h3, out_pad), jnp.float32).at[:, :out_dim].set(params["w4"])
    b4_p = jnp.zeros((1, out_pad), jnp.float32).at[:, :out_dim].set(params["b4"])

    # --- bf16 matmul operands (f32 accumulation happens inside the kernel) ---
    x_bf = x.astype(jnp.bfloat16)
    w1 = params["w1"].astype(jnp.bfloat16)
    w2 = params["w2"].astype(jnp.bfloat16)
    w3 = params["w3"].astype(jnp.bfloat16)
    w4 = w4_p.astype(jnp.bfloat16)
    b1, b2, b3, b4 = params["b1"], params["b2"], params["b3"], b4_p  # f32

    # --- batch tiling: tile must be a multiple of 8 (sublane); pad B to tile multiple ---
    B8 = ((B + 7) // 8) * 8
    tb = max(8, min(((tile_batch + 7) // 8) * 8, B8))
    B_pad = ((B8 + tb - 1) // tb) * tb
    if B_pad != B:
        x_bf = jnp.zeros((B_pad, in_dim), jnp.bfloat16).at[:B, :].set(x_bf)
    grid = (B_pad // tb,)

    # --- cost estimate (per review: helps XLA schedule the custom call) ---
    flops = 2 * B_pad * (in_dim * h1 + h1 * h2 + h2 * h3 + h3 * out_pad)
    bytes_accessed = (B_pad * in_dim * 2 + B_pad * out_pad * 4            # x in, y out
                      + (w1.size + w2.size + w3.size + w4.size) * 2       # bf16 weights
                      + (b1.size + b2.size + b3.size + b4.size) * 4)      # f32 biases
    cost = pl.CostEstimate(flops=flops, transcendentals=B_pad * out_pad,
                           bytes_accessed=bytes_accessed)

    # BlockSpecs: x/out tiled over batch; weights/biases resident (same block each step).
    x_spec = pl.BlockSpec((tb, in_dim), lambda i: (i, 0))
    resident = lambda a: pl.BlockSpec(a.shape, lambda i: (0, 0))
    out_spec = pl.BlockSpec((tb, out_pad), lambda i: (i, 0))

    y_pad = pl.pallas_call(
        qlinearnet_kernel,
        out_shape=jax.ShapeDtypeStruct((B_pad, out_pad), jnp.float32),
        grid=grid,
        in_specs=[x_spec,
                  resident(w1), resident(b1),
                  resident(w2), resident(b2),
                  resident(w3), resident(b3),
                  resident(w4), resident(b4)],
        out_specs=out_spec,
        compiler_params=pltpu.CompilerParams(
            dimension_semantics=("parallel",)),  # v7x: shard batch tiles across 2 TCs
        cost_estimate=cost,
    )(x_bf, w1, b1, w2, b2, w3, b3, w4, b4)

    # Slice off batch padding and lane padding.
    return y_pad[:B, :out_dim]


def init_params(key, input_size, hidden1, hidden2, hidden3, output_size):
    """Deterministic init mimicking PyTorch nn.Linear default: U(-1/sqrt(fan_in), +1/sqrt(fan_in))."""
    dims = [(input_size, hidden1), (hidden1, hidden2), (hidden2, hidden3), (hidden3, output_size)]
    params = {}
    for idx, (fan_in, fan_out) in enumerate(dims, start=1):
        key, kw, kb = jax.random.split(key, 3)
        bound = 1.0 / jnp.sqrt(float(fan_in))
        # stored transposed: (in_features, out_features)
        params[f"w{idx}"] = jax.random.uniform(kw, (fan_in, fan_out), jnp.float32, -bound, bound)
        params[f"b{idx}"] = jax.random.uniform(kb, (1, fan_out), jnp.float32, -bound, bound)
    return params


def reference_forward(x, params):
    """Pure-JAX f32 reference (matches the PyTorch module's math)."""
    h = jnp.maximum(x @ params["w1"] + params["b1"], 0.0)
    h = jnp.maximum(h @ params["w2"] + params["b2"], 0.0)
    h = jnp.maximum(h @ params["w3"] + params["b3"], 0.0)
    return jax.nn.sigmoid(h @ params["w4"] + params["b4"])


if __name__ == "__main__":
    # Small shapes consistent with the module's forward (batch of feature vectors).
    # TODO(synk): despite the "Q" in QLinearNet, the PyTorch module is plain fp32 nn.Linear;
    # no int8/quantized path is implemented (and int8 would not map to v7x's MXU anyway).
    batch, input_size, hidden1, hidden2, hidden3, output_size = 8, 32, 64, 64, 32, 16

    key = jax.random.PRNGKey(0)
    key, kx = jax.random.split(key)
    x = jax.random.normal(kx, (batch, input_size), jnp.float32)
    params = init_params(key, input_size, hidden1, hidden2, hidden3, output_size)

    out = qlinearnet_forward(x, params)
    out = jax.block_until_ready(out)

    ref = reference_forward(x, params)
    assert out.shape == (batch, output_size), f"bad shape {out.shape}"
    # bf16 matmul operands (f32 accumulation) vs f32 reference: allow ~1% on sigmoid outputs.
    assert jnp.allclose(out, ref, atol=2e-2, rtol=0.0), "Pallas output mismatch vs reference"

    print("KERNEL_OK")
</pallas_src>

<mosaic_0001>
module attributes {stable_mosaic.version = 11 : i64} {
  func.func @qlinearnet_kernel(%arg0: i32, %arg1: memref<8x32xbf16, #tpu.memory_space<vmem>>, %arg2: memref<32x64xbf16, #tpu.memory_space<vmem>>, %arg3: memref<1x64xf32, #tpu.memory_space<vmem>>, %arg4: memref<64x64xbf16, #tpu.memory_space<vmem>>, %arg5: memref<1x64xf32, #tpu.memory_space<vmem>>, %arg6: memref<64x32xbf16, #tpu.memory_space<vmem>>, %arg7: memref<1x32xf32, #tpu.memory_space<vmem>>, %arg8: memref<32x128xbf16, #tpu.memory_space<vmem>>, %arg9: memref<1x128xf32, #tpu.memory_space<vmem>>, %arg10: memref<8x128xf32, #tpu.memory_space<vmem>>) attributes {dimension_semantics = [#tpu.dimension_semantics<parallel>], iteration_bounds = array<i64: 1>, scalar_prefetch = 0 : i64, scratch_operands = 0 : i64, tpu.core_type = #tpu.core_type<tc>, window_params = [{transform_indices = @transform_0, window_bounds = array<i64: 8, 32>}, {pipeline_mode = #tpu.pipeline_mode<synchronous>, transform_indices = @transform_1, window_bounds = array<i64: 32, 64>}, {pipeline_mode = #tpu.pipeline_mode<synchronous>, transform_indices = @transform_2, window_bounds = array<i64: 1, 64>}, {pipeline_mode = #tpu.pipeline_mode<synchronous>, transform_indices = @transform_3, window_bounds = array<i64: 64, 64>}, {pipeline_mode = #tpu.pipeline_mode<synchronous>, transform_indices = @transform_4, window_bounds = array<i64: 1, 64>}, {pipeline_mode = #tpu.pipeline_mode<synchronous>, transform_indices = @transform_5, window_bounds = array<i64: 64, 32>}, {pipeline_mode = #tpu.pipeline_mode<synchronous>, transform_indices = @transform_6, window_bounds = array<i64: 1, 32>}, {pipeline_mode = #tpu.pipeline_mode<synchronous>, transform_indices = @transform_7, window_bounds = array<i64: 32, 128>}, {pipeline_mode = #tpu.pipeline_mode<synchronous>, transform_indices = @transform_8, window_bounds = array<i64: 1, 128>}, {transform_indices = @transform_9, window_bounds = array<i64: 8, 128>}]} {
    %c0 = arith.constant 0 : index
    %c0_0 = arith.constant 0 : index
    %0 = vector.load %arg3[%c0, %c0_0] : memref<1x64xf32, #tpu.memory_space<vmem>>, vector<1x64xf32>
    %c0_1 = arith.constant 0 : index
    %c0_2 = arith.constant 0 : index
    %1 = vector.load %arg5[%c0_1, %c0_2] : memref<1x64xf32, #tpu.memory_space<vmem>>, vector<1x64xf32>
    %c0_3 = arith.constant 0 : index
    %c0_4 = arith.constant 0 : index
    %2 = vector.load %arg7[%c0_3, %c0_4] : memref<1x32xf32, #tpu.memory_space<vmem>>, vector<1x32xf32>
    %c0_5 = arith.constant 0 : index
    %c0_6 = arith.constant 0 : index
    %3 = vector.load %arg9[%c0_5, %c0_6] : memref<1x128xf32, #tpu.memory_space<vmem>>, vector<1x128xf32>
    %c0_7 = arith.constant 0 : index
    %c0_8 = arith.constant 0 : index
    %4 = vector.load %arg1[%c0_7, %c0_8] : memref<8x32xbf16, #tpu.memory_space<vmem>>, vector<8x32xbf16>
    %c0_9 = arith.constant 0 : index
    %c0_10 = arith.constant 0 : index
    %5 = vector.load %arg2[%c0_9, %c0_10] : memref<32x64xbf16, #tpu.memory_space<vmem>>, vector<32x64xbf16>
    %cst = arith.constant dense<0.000000e+00> : vector<8x64xf32>
    %6 = tpu.matmul %4, %5, %cst {dimension_numbers = #tpu.dot_dimension_numbers<[1], [0], [0], [1], [0, 0, 1, 1], [], []>} : vector<8x32xbf16>, vector<32x64xbf16>, vector<8x64xf32> -> vector<8x64xf32>
    %7 = vector.broadcast %0 : vector<1x64xf32> to vector<8x64xf32>
    %8 = arith.addf %6, %7 : vector<8x64xf32>
    %cst_11 = arith.constant 0.000000e+00 : f32
    %9 = vector.broadcast %cst_11 : f32 to vector<8x64xf32>
    %10 = arith.maximumf %8, %9 : vector<8x64xf32>
    %11 = arith.truncf %10 : vector<8x64xf32> to vector<8x64xbf16>
    %c0_12 = arith.constant 0 : index
    %c0_13 = arith.constant 0 : index
    %12 = vector.load %arg4[%c0_12, %c0_13] : memref<64x64xbf16, #tpu.memory_space<vmem>>, vector<64x64xbf16>
    %cst_14 = arith.constant dense<0.000000e+00> : vector<8x64xf32>
    %13 = tpu.matmul %11, %12, %cst_14 {dimension_numbers = #tpu.dot_dimension_numbers<[1], [0], [0], [1], [0, 0, 1, 1], [], []>} : vector<8x64xbf16>, vector<64x64xbf16>, vector<8x64xf32> -> vector<8x64xf32>
    %14 = vector.broadcast %1 : vector<1x64xf32> to vector<8x64xf32>
    %15 = arith.addf %13, %14 : vector<8x64xf32>
    %cst_15 = arith.constant 0.000000e+00 : f32
    %16 = vector.broadcast %cst_15 : f32 to vector<8x64xf32>
    %17 = arith.maximumf %15, %16 : vector<8x64xf32>
    %18 = arith.truncf %17 : vector<8x64xf32> to vector<8x64xbf16>
    %c0_16 = arith.constant 0 : index
    %c0_17 = arith.constant 0 : index
    %19 = vector.load %arg6[%c0_16, %c0_17] : memref<64x32xbf16, #tpu.memory_space<vmem>>, vector<64x32xbf16>
    %cst_18 = arith.constant dense<0.000000e+00> : vector<8x32xf32>
    %20 = tpu.matmul %18, %19, %cst_18 {dimension_numbers = #tpu.dot_dimension_numbers<[1], [0], [0], [1], [0, 0, 1, 1], [], []>} : vector<8x64xbf16>, vector<64x32xbf16>, vector<8x32xf32> -> vector<8x32xf32>
    %21 = vector.broadcast %2 : vector<1x32xf32> to vector<8x32xf32>
    %22 = arith.addf %20, %21 : vector<8x32xf32>
    %cst_19 = arith.constant 0.000000e+00 : f32
    %23 = vector.broadcast %cst_19 : f32 to vector<8x32xf32>
    %24 = arith.maximumf %22, %23 : vector<8x32xf32>
    %25 = arith.truncf %24 : vector<8x32xf32> to vector<8x32xbf16>
    %c0_20 = arith.constant 0 : index
    %c0_21 = arith.constant 0 : index
    %26 = vector.load %arg8[%c0_20, %c0_21] : memref<32x128xbf16, #tpu.memory_space<vmem>>, vector<32x128xbf16>
    %cst_22 = arith.constant dense<0.000000e+00> : vector<8x128xf32>
    %27 = tpu.matmul %25, %26, %cst_22 {dimension_numbers = #tpu.dot_dimension_numbers<[1], [0], [0], [1], [0, 0, 1, 1], [], []>} : vector<8x32xbf16>, vector<32x128xbf16>, vector<8x128xf32> -> vector<8x128xf32>
    %28 = vector.broadcast %3 : vector<1x128xf32> to vector<8x128xf32>
    %29 = arith.addf %27, %28 : vector<8x128xf32>
    %30 = arith.negf %29 : vector<8x128xf32>
    %31 = math.exp %30 : vector<8x128xf32>
    %cst_23 = arith.constant 1.000000e+00 : f32
    %32 = vector.broadcast %cst_23 : f32 to vector<8x128xf32>
    %33 = arith.addf %32, %31 : vector<8x128xf32>
    %34 = arith.divf %32, %33 : vector<8x128xf32>
    %c0_24 = arith.constant 0 : index
    %c0_25 = arith.constant 0 : index
    %35 = vector.load %arg10[%c0_24, %c0_25] : memref<8x128xf32, #tpu.memory_space<vmem>>, vector<8x128xf32>
    tpu.vector_store %arg10[%c0_24, %c0_25], %34 {strides = array<i32>} : memref<8x128xf32, #tpu.memory_space<vmem>>, vector<8x128xf32>,
    return
  }
  func.func @transform_0(%arg0: i32) -> (i32, i32) {
    %c0_i32 = arith.constant 0 : i32
    %c0_i32_0 = arith.constant 0 : i32
    return %arg0, %c0_i32 : i32, i32
  }
  func.func @transform_1(%arg0: i32) -> (i32, i32) {
    %c0_i32 = arith.constant 0 : i32
    %c0_i32_0 = arith.constant 0 : i32
    %c0_i32_1 = arith.constant 0 : i32
    return %c0_i32, %c0_i32_0 : i32, i32
  }
  func.func @transform_2(%arg0: i32) -> (i32, i32) {
    %c0_i32 = arith.constant 0 : i32
    %c0_i32_0 = arith.constant 0 : i32
    %c0_i32_1 = arith.constant 0 : i32
    return %c0_i32, %c0_i32_0 : i32, i32
  }
  func.func @transform_3(%arg0: i32) -> (i32, i32) {
    %c0_i32 = arith.constant 0 : i32
    %c0_i32_0 = arith.constant 0 : i32
    %c0_i32_1 = arith.constant 0 : i32
    return %c0_i32, %c0_i32_0 : i32, i32
  }
  func.func @transform_4(%arg0: i32) -> (i32, i32) {
    %c0_i32 = arith.constant 0 : i32
    %c0_i32_0 = arith.constant 0 : i32
    %c0_i32_1 = arith.constant 0 : i32
    return %c0_i32, %c0_i32_0 : i32, i32
  }
  func.func @transform_5(%arg0: i32) -> (i32, i32) {
    %c0_i32 = arith.constant 0 : i32
    %c0_i32_0 = arith.constant 0 : i32
    %c0_i32_1 = arith.constant 0 : i32
    return %c0_i32, %c0_i32_0 : i32, i32
  }
  func.func @transform_6(%arg0: i32) -> (i32, i32) {
    %c0_i32 = arith.constant 0 : i32
    %c0_i32_0 = arith.constant 0 : i32
    %c0_i32_1 = arith.constant 0 : i32
    return %c0_i32, %c0_i32_0 : i32, i32
  }
  func.func @transform_7(%arg0: i32) -> (i32, i32) {
    %c0_i32 = arith.constant 0 : i32
    %c0_i32_0 = arith.constant 0 : i32
    %c0_i32_1 = arith.constant 0 : i32
    return %c0_i32, %c0_i32_0 : i32, i32
  }
  func.func @transform_8(%arg0: i32) -> (i32, i32) {
    %c0_i32 = arith.constant 0 : i32
    %c0_i32_0 = arith.constant 0 : i32
    %c0_i32_1 = arith.constant 0 : i32
    return %c0_i32, %c0_i32_0 : i32, i32
  }
  func.func @transform_9(%arg0: i32) -> (i32, i32) {
    %c0_i32 = arith.constant 0 : i32
    %c0_i32_0 = arith.constant 0 : i32
    return %arg0, %c0_i32 : i32, i32
  }
}

</mosaic_0001>

<bundles_post_ra>
// kernel: tpu_custom_call.1
= control target key start
LH: loop header
LB: loop body
LE: loop exit
PB: predicated region body
PF: predicated region fallthrough
CT: control target
= control target key end

     0   :  { %14 = vsyncpa [#allocation3], 0  ;;  %s710_s0 = inlined_call_operand.hbm [shape: bf16[8,32], index: 0, kind: input, shape index: {}]   ;;  %s711_s1 = inlined_call_operand.vmem [shape: bf16[32,64], index: 1, kind: input, shape index: {}]   ;;  %s712_s2 = inlined_call_operand.vmem [shape: f32[1,64], index: 2, kind: input, shape index: {}]   ;;  %s713_s3 = inlined_call_operand.vmem [shape: bf16[64,64], index: 3, kind: input, shape index: {}]   ;;  %s714_s4 = inlined_call_operand.vmem [shape: f32[1,64], index: 4, kind: input, shape index: {}]   ;;  %s715_s5 = inlined_call_operand.vmem [shape: bf16[64,32], index: 5, kind: input, shape index: {}]   ;;  %s716_s6 = inlined_call_operand.vmem [shape: f32[1,32], index: 6, kind: input, shape index: {}]   ;;  %s717_s7 = inlined_call_operand.hbm [shape: bf16[32,128], index: 7, kind: input, shape index: {}]   ;;  %s718_s8 = inlined_call_operand.vmem [shape: f32[1,128], index: 8, kind: input, shape index: {}]   ;;  %s719_s9 = inlined_call_operand.hbm [shape: f32[8,128], index: 9, kind: output, shape index: {}]  }
   0x1   :  { %15 = vsyncpa [#allocation6], 0 }
   0x2   :  { %16 = vsyncpa [#allocation4], 0  ;;  %s560_s30 = smov [#allocation2]   ;;  %s561_s11 = smov [#allocation5]  }
   0x3   :  { %s23_s10 = sshll.u32 %s560_s30, 4  ;;  %s44_s12 = sshll.u32 %s561_s11, 4  ;;  %s24_s10 = int_to_ptr.vmem [resolvable:$true] %s23_s10  ;;  %s617_s12 = int_to_ptr.vmem [resolvable:$true] %s44_s12 }
   0x4   :  { %s488_s15 = scalar_lea.hbm %s710_s0, 64 }
   0x5   :  { %p489_p0 = scmp.ne.s32.totalorder %s710_s0, %s488_s15  ;;  %p492_p1 = scmp.lt.u32.totalorder %s488_s15, %s710_s0 }
   0x7   :  { %p494_p2 = pnand %p492_p1, %p489_p0 }
   0x9   :  { %497 = shalt.err (!%p494_p2)
}
   0xa   :  { %s498_s20 = scalar_lea.vmem %s24_s10, 64  ;;  %p503_p4 = scmp.lt.s32.totalorder %s24_s10, %s24_s10 }
   0xb   :  { %p499_p3 = scmp.ne.s32.totalorder %s24_s10, %s498_s20  ;;  %p504_p5 = scmp.lt.s32.totalorder %s498_s20, %s498_s20 }
   0xd   :  { %p505_p6 = por %p504_p5, %p503_p4 }
   0xf   :  { %p506_p7 = pnand %p505_p6, %p499_p3 }
  0x11   :  { %509 = shalt.err (!%p506_p7)
}
  0x12   :  { %26 = dma.hbm_to_vmem [thread:$0]  %s710_s0, 64, %s24_s10, [#allocation3]  }
  0x13   :  { %s510_s25 = scalar_lea.hbm %s717_s7, 256 }
  0x14   :  { %p511_p8 = scmp.ne.s32.totalorder %s717_s7, %s510_s25  ;;  %p514_p9 = scmp.lt.u32.totalorder %s510_s25, %s717_s7 }
  0x16   :  { %p516_p10 = pnand %p514_p9, %p511_p8 }
  0x18   :  { %519 = shalt.err (!%p516_p10)
}
  0x19   :  { %s520_s30 = scalar_lea.vmem %s617_s12, 256  ;;  %p525_p12 = scmp.lt.s32.totalorder %s617_s12, %s617_s12 }
  0x1a   :  { %p521_p11 = scmp.ne.s32.totalorder %s617_s12, %s520_s30  ;;  %p526_p13 = scmp.lt.s32.totalorder %s520_s30, %s520_s30 }
  0x1c   :  { %p527_p0 = por %p526_p13, %p525_p12 }
  0x1e   :  { %p528_p1 = pnand %p527_p0, %p521_p11 }
  0x20   :  { %531 = shalt.err (!%p528_p1)
}
  0x21   :  { %s562_s0 = smov 64   ;;  %s563_s10 = smov 4  }
  0x22   :  { %50 = dma.hbm_to_vmem [thread:$0]  %s717_s7, 256, %s617_s12, [#allocation6], %s562_s0, %s562_s0, %s563_s10  }
  0x23   :  { %554 = dma.done.wait [#allocation3], 64  }
  0x24   :  { %555 = vsyncadd [#allocation3], 4294967232 }
  0x25   :  { %556 = dma.done.wait [#allocation6], 256  }
  0x26   :  { %557 = vsyncadd [#allocation6], 4294967040  ;;  %v564_v0 = vmov 0.0   ;;  %vm565_vm0 = vmmov 0   ;;  %v472_v1 = vld [vmem:[%s711_s1] sm:$0xff]   ;;  %v473_v2 = vld [vmem:[%s711_s1 + $0x8] sm:$0xff]  }
  0x27   :  { %425 = vmatprep.subr.bf16.mxu0 %v564_v0  ;;  %429 = vmatprep.mubr.msk.bf16.mxu0 %vm565_vm0, %v564_v0  ;;  %v474_v3 = vld [vmem:[%s713_s3] sm:$0xff]   ;;  %vm87_vm1 = vcmask 261120   ;;  %v475_v5 = vld [vmem:[%s713_s3 + $0x8] sm:$0xff]   ;;  %v476_v6 = vld [vmem:[%s713_s3 + $0x10] sm:$0xff]   ;;  %vm171_vm2 = vcmask 523264  }
  0x28   :  { %433 = vmatprep.subr.bf16.mxu1 %v564_v0  ;;  %441 = vmatprep.mubr.msk.bf16.mxu1 %vm565_vm0, %v564_v0  ;;  %v64_v4 = vld [vmem:[#allocation2] sm:$0xf]  ;;  %v477_v7 = vld [vmem:[%s713_s3 + $0x18] sm:$0xff]   ;;  %v479_v9 = vld [vmem:[%s715_s5 + $0x8] sm:$0xff]  }
  0x29   :  { %426 = vmatpush3.bf16.msra.mxu0 %v472_v1  ;;  %434 = vmatpush3.bf16.msra.mxu1 %v474_v3  ;;  %v478_v8 = vld [vmem:[%s715_s5] sm:$0xff]   ;;  %v480_v18 = vld [vmem:[%s715_s5 + $0x10] sm:$0xff]   ;;  %v481_v19 = vld [vmem:[%s715_s5 + $0x18] sm:$0xff]  }
  0x2a   :  { %427 = vmatprep.subr.bf16.mxu0 %v564_v0  ;;  %435 = vmatprep.subr.bf16.mxu1 %v564_v0  ;;  %v388_v10 = vld [vmem:[%s712_s2] ss:$0 sm:$0xff]  ;;  %v482_v20 = vld [vmem:[#allocation5] sm:$0xff]   ;;  %v483_v29 = vld [vmem:[#allocation5 + $0x8] sm:$0xff]  }
  0x2b   :  { %v392_v21 = vld [vmem:[%s714_s4] ss:$0 sm:$0xff] }
  0x2c   :  { %v398_v30 = vld [vmem:[%s716_s6] ss:$0 sm:$0xff]  ;;  %s566_s6 = smov [#allocation7]  }
  0x2d   :  { %428 = vmatpush3.bf16.msra.mxu0 %v473_v2  ;;  %436 = vmatpush3.bf16.msra.mxu1 %v475_v5  ;;  %v404_v38 = vld [vmem:[%s718_s8] ss:$0 sm:$0xff]  ;;  %s378_s14 = sshll.u32 %s566_s6, 4  ;;  %s379_s14 = int_to_ptr.vmem [resolvable:$true] %s378_s14 }
  0x2e   :  { %445 = vmatprep.subr.bf16.mxu0 %v564_v0  ;;  %437 = vmatprep.subr.bf16.mxu1 %v564_v0  ;;  %s532_s15 = scalar_lea.vmem %s379_s14, 128  ;;  %p537_p3 = scmp.lt.s32.totalorder %s379_s14, %s379_s14 }
  0x2f   :  { %p533_p2 = scmp.ne.s32.totalorder %s379_s14, %s532_s15  ;;  %p538_p4 = scmp.lt.s32.totalorder %s532_s15, %s532_s15 }
  0x30   :  { %430 = vmatmul.mubr.msk.bf16.vlgmr.msra.gmra.mrb[0].mxu0 %vm87_vm1, %v64_v4 }
  0x31   :  { %453 = vmatprep.mubr.msk.bf16.mxu0 %vm565_vm0, %v564_v0  ;;  %438 = vmatpush3.bf16.msra.mxu1 %v476_v6  ;;  %p539_p5 = por %p538_p4, %p537_p3 }
  0x32   :  { %439 = vmatprep.subr.bf16.mxu1 %v564_v0  ;;  %446 = vmatpush3.bf16.msra.mxu0 %v478_v8 }
  0x33   :  { %447 = vmatprep.subr.bf16.mxu0 %v564_v0  ;;  %p540_p6 = pnand %p539_p5, %p533_p2 }
  0x35   :  { %440 = vmatpush3.bf16.msra.mxu1 %v477_v7 }
  0x36   :  { %457 = vmatprep.subr.bf16.mxu1 %v564_v0  ;;  %448 = vmatpush3.bf16.msra.mxu0 %v479_v9 }
  0x37   :  { %449 = vmatprep.subr.bf16.mxu0 %v564_v0 }
  0x3a   :  { %450 = vmatpush3.bf16.msra.mxu0 %v480_v18 }
  0x3b   :  { %451 = vmatprep.subr.bf16.mxu0 %v564_v0 }
  0x3e   :  { %452 = vmatpush3.bf16.msra.mxu0 %v481_v19 }
 0x103   :  { %v125_v11 = vpop.f32.mrb[0].mxu0 }
 0x104   :  { %v126_v12 = vadd.f32 %v388_v10, %v125_v11  ;;  %v431_v13 = vpop.f32.mrb[1].mxu0 }
 0x105   :  { %v128_v14 = vpop.f32.mrb[2].mxu0 }
 0x106   :  { %v131_v15 = vmax.f32 %v126_v12, 0.0  ;;  %v432_v16 = vpop.f32.mrb[3].mxu0 }
 0x108   :  { %v132_v17 = vpack.c.bf16 %v131_v15, %v131_v15 }
 0x10a   :  { %442 = vmatmul.mubr.msk.bf16.vlgmr.msra.gmra.mrb[0].mxu1 %vm171_vm2, %v132_v17 }
 0x10b   :  { %461 = vmatprep.mubr.msk.bf16.mxu1 %vm565_vm0, %v564_v0  ;;  %458 = vmatpush3.bf16.msra.mxu1 %v482_v20 }
 0x10c   :  { %459 = vmatprep.subr.bf16.mxu1 %v564_v0 }
 0x10f   :  { %460 = vmatpush3.bf16.msra.mxu1 %v483_v29 }
 0x1dd   :  { %v209_v22 = vpop.f32.mrb[0].mxu1 }
 0x1de   :  { %v210_v23 = vadd.f32 %v392_v21, %v209_v22  ;;  %v443_v24 = vpop.f32.mrb[1].mxu1 }
 0x1df   :  { %v212_v25 = vpop.f32.mrb[2].mxu1 }
 0x1e0   :  { %v215_v26 = vmax.f32 %v210_v23, 0.0  ;;  %v444_v27 = vpop.f32.mrb[3].mxu1 }
 0x1e2   :  { %v216_v28 = vpack.c.bf16 %v215_v26, %v215_v26 }
 0x1e4   :  { %454 = vmatmul.mubr.msk.bf16.vlgmr.msra.gmra.mrb[4].mxu0 %vm171_vm2, %v216_v28 }
 0x2b7   :  { %v292_v31 = vpop.f32.mrb[4].mxu0 }
 0x2b8   :  { %v293_v32 = vadd.f32 %v398_v30, %v292_v31  ;;  %v455_v33 = vpop.f32.mrb[5].mxu0 }
 0x2b9   :  { %v295_v34 = vpop.f32.mrb[6].mxu0 }
 0x2ba   :  { %v298_v35 = vmax.f32 %v293_v32, 0.0  ;;  %v456_v36 = vpop.f32.mrb[7].mxu0 }
 0x2bc   :  { %v299_v37 = vpack.c.bf16 %v298_v35, %v298_v35 }
 0x2be   :  { %462 = vmatmul.mubr.msk.bf16.vlgmr.msra.gmra.mrb[4].mxu1 %vm87_vm1, %v299_v37 }
 0x391   :  { %v359_v39 = vpop.f32.mrb[4].mxu1 }
 0x392   :  { %v360_v40 = vadd.f32 %v404_v38, %v359_v39  ;;  %v463_v41 = vpop.f32.mrb[5].mxu1 }
 0x393   :  { %v362_v42 = vpop.f32.mrb[6].mxu1 }
 0x394   :  { %v408_v43 = vmul.f32 -1.442695, %v360_v40  ;;  %v464_v44 = vpop.f32.mrb[7].mxu1 }
 0x396   :  { %484 = vpow2.f32 %v408_v43 }
 0x3a0   :  { %v485_v45 = vpop.eup %484 }
 0x3a1   :  { %v368_v46 = vadd.f32 1.0, %v485_v45 }
 0x3a3   :  { %486 = vrcp.f32 %v368_v46 }
 0x3ad   :  { %v487_v47 = vpop.eup %486 }
 0x3ae   :  { %371 = vst [vmem:[#allocation7] sm:$0xff] %v487_v47 }
 0x3af   :  { %543 = shalt.err (!%p540_p6)
}
 0x3b0   :  { %s544_s17 = scalar_lea.hbm %s719_s9, 128 }
 0x3b1   :  { %p545_p7 = scmp.ne.s32.totalorder %s719_s9, %s544_s17  ;;  %p548_p8 = scmp.lt.u32.totalorder %s544_s17, %s719_s9 }
 0x3b3   :  { %p550_p9 = pnand %p548_p8, %p545_p7 }
 0x3b5   :  { %553 = shalt.err (!%p550_p9)
}
 0x3b6   :  { %381 = dma.vmem_to_hbm [thread:$0]  %s379_s14, 128, %s719_s9, [#allocation4]  }
 0x3b7   :  { %558 = dma.done.wait [#allocation4], 128  }
 0x3b8   :  { %559 = vsyncadd [#allocation4], 4294967168 }
 0x3b9   :  { %385 = vsyncpa [#allocation3], 1 }
 0x3ba   :  { %386 = vsyncpa [#allocation6], 1 }
 0x3bb   :  { %387 = vsyncpa [#allocation4], 1 }

</bundles_post_ra>
